<compile_context>
chip_gen: v7x
topology: tpu7x:2x2x1
jax: 0.10.0
libtpu: 0.0.40
codegen_flags: <defaults>
</compile_context>

<pallas_src>
import math

import jax
import jax.numpy as jnp
from jax.experimental import pallas as pl
from jax.experimental.pallas import tpu as pltpu

_LANES = 128
_SUBLANES = 8
_OUT_TILE_BYTES = 4 * 1024 * 1024  # ~4 MiB output tile per grid step


def _round_up(n: int, m: int) -> int:
    return ((n + m - 1) // m) * m


def _pe_kernel(xy_ref, w_ref, ph_ref, out_ref):
    # xy_ref : (TMG, 2G)  interleaved coords [x0, y0, x1, y1, ...] (G points/row)
    # w_ref  : (2G, L)    block-diagonal div-term table (resident constant)
    # ph_ref : (1, L)     phase table (0 / pi/2) -- cos(t) == sin(t + pi/2)
    # out_ref: (TMG, L)   lane-dense output (L % 128 == 0)
    arg = jnp.dot(
        xy_ref[...],
        w_ref[...],
        preferred_element_type=jnp.float32,
        precision=jax.lax.Precision.HIGHEST,  # keep f32-accurate args on the MXU
    )
    out_ref[...] = jnp.sin(arg + ph_ref[...]).astype(out_ref.dtype)


def make_div_term(embed_dim: int) -> jnp.ndarray:
    if embed_dim % 2 != 0:
        raise ValueError(f"embed_dim must be even, got {embed_dim}")
    half_dim = embed_dim // 2
    idx = jnp.arange(0, half_dim, 2, dtype=jnp.float32)
    return jnp.exp(idx * (-(math.log(10000.0) / half_dim)))  # (D,)


def sinusoidal_positional_encoder(
    coords: jnp.ndarray,
    embed_dim: int,
    *,
    block_rows: int = 8192,
    out_dtype=jnp.float32,
) -> jnp.ndarray:
    """coords: (..., 2) -> (..., 4*ceil((embed_dim//2)/2)) in out_dtype."""
    div = make_div_term(embed_dim)  # (D,)
    D = int(div.shape[0])
    FD = 4 * D  # per-point encoding width (== embed_dim when embed_dim % 4 == 0)

    # Fold G coordinate points into the lane axis so the output width L is a
    # multiple of 128 (unmasked, lane-dense stores) for ANY embed_dim.
    G = math.lcm(FD, _LANES) // FD  # == 32 // gcd(D, 32)  (so G <= 32)
    L = G * FD
    K = 2 * G

    # --- constant tables (built once in XLA, tiny, resident in VMEM) ---------
    z = jnp.zeros((D,), jnp.float32)
    hp = jnp.full((D,), jnp.float32(math.pi / 2.0), dtype=jnp.float32)
    dx = jnp.concatenate([div, div, z, z])        # (FD,) multiplies x
    dy = jnp.concatenate([z, z, div, div])        # (FD,) multiplies y
    ph_blk = jnp.concatenate([z, hp, z, hp])      # (FD,) phase: cos = sin(.+pi/2)

    eye = jnp.eye(G, dtype=jnp.float32)
    wx = jnp.kron(eye, dx.reshape(1, FD))         # (G, L): row g -> dx at block g
    wy = jnp.kron(eye, dy.reshape(1, FD))         # (G, L): row g -> dy at block g
    # Interleave x/y rows to match coords.reshape(MG, 2G) = [x0,y0,x1,y1,...].
    w = jnp.stack([wx, wy], axis=1).reshape(K, L)  # (2G, L)
    ph = jnp.tile(ph_blk, (G,)).reshape(1, L)      # (1, L)

    # --- fold coordinates -----------------------------------------------------
    lead = coords.shape[:-1]
    M = int(math.prod(lead)) if lead else 1
    coords_flat = coords.reshape(M, 2).astype(jnp.float32)

    MG = -(-M // G)          # ceil(M / G) folded rows
    M_pad = MG * G           # pad only to a multiple of G (needed for the fold)
    if M_pad != M:
        coords_flat = jnp.pad(coords_flat, ((0, M_pad - M), (0, 0)))
    xy = coords_flat.reshape(MG, K)  # (MG, 2G), interleaved x/y

    # --- tile size: big (~4 MiB output tile) but VMEM-safe on all gens --------
    bytes_per_row = L * 4
    cap = max(_SUBLANES, (_OUT_TILE_BYTES // bytes_per_row) // _SUBLANES * _SUBLANES)
    tmg = min(block_rows, cap, _round_up(MG, _SUBLANES))
    tmg = max(_SUBLANES, (tmg // _SUBLANES) * _SUBLANES)

    grid = (pl.cdiv(MG, tmg),)  # ragged last block handled by Pallas (no MG padding)

    out_folded = pl.pallas_call(
        _pe_kernel,
        out_shape=jax.ShapeDtypeStruct((MG, L), out_dtype),
        grid_spec=pl.GridSpec(
            grid=grid,
            in_specs=[
                pl.BlockSpec((tmg, K), lambda i: (i, 0)),   # folded coords
                pl.BlockSpec((K, L), lambda i: (0, 0)),     # resident div table
                pl.BlockSpec((1, L), lambda i: (0, 0)),     # resident phase table
            ],
            out_specs=pl.BlockSpec((tmg, L), lambda i: (i, 0)),
        ),
        compiler_params=pltpu.CompilerParams(
            dimension_semantics=("parallel",),  # shard row loop across TCs (v7x)
        ),
    )(xy, w, ph)

    # Un-fold: (MG, G*FD) -> (M_pad, FD) is a free contiguous reshape (bitcast).
    out = out_folded.reshape(M_pad, FD)
    if M_pad != M:
        out = out[:M]  # only materializes a copy when M % G != 0
    return out.reshape(*lead, FD)


def _reference(coords: jnp.ndarray, embed_dim: int) -> jnp.ndarray:
    div = make_div_term(embed_dim)
    pos_x = coords[..., 0:1].astype(jnp.float32)
    pos_y = coords[..., 1:2].astype(jnp.float32)
    pe_x = jnp.concatenate([jnp.sin(pos_x * div), jnp.cos(pos_x * div)], axis=-1)
    pe_y = jnp.concatenate([jnp.sin(pos_y * div), jnp.cos(pos_y * div)], axis=-1)
    return jnp.concatenate([pe_x, pe_y], axis=-1)


if __name__ == "__main__":
    embed_dim = 32            # half_dim = 16 -> D = 8 -> output last dim = 32
    batch, seq = 2, 8
    max_coord_val = 512

    key = jax.random.PRNGKey(0)
    coords = jax.random.uniform(
        key, (batch, seq, 2), dtype=jnp.float32,
        minval=0.0, maxval=float(max_coord_val),
    )

    out = sinusoidal_positional_encoder(coords, embed_dim)
    out = jax.block_until_ready(out)

    ref = _reference(coords, embed_dim)
    assert out.shape == (batch, seq, embed_dim), out.shape
    # cos(t)=sin(t+pi/2) fusion + HIGHEST-precision MXU arg construction give
    # argument rounding of a few f32 ulps at coord ~512 (~1e-4 abs in sin).
    assert jnp.allclose(out, ref, atol=5e-4, rtol=1e-4), (
        "mismatch vs reference, max abs diff="
        + str(float(jnp.max(jnp.abs(out - ref))))
    )

    print("KERNEL_OK")
</pallas_src>

<mosaic_0001>
module attributes {stable_mosaic.version = 11 : i64} {
  func.func @_pe_kernel(%arg0: i32, %arg1: memref<8x8xf32, #tpu.memory_space<vmem>>, %arg2: memref<8x128xf32, #tpu.memory_space<vmem>>, %arg3: memref<1x128xf32, #tpu.memory_space<vmem>>, %arg4: memref<8x128xf32, #tpu.memory_space<vmem>>) attributes {dimension_semantics = [#tpu.dimension_semantics<parallel>], iteration_bounds = array<i64: 1>, scalar_prefetch = 0 : i64, scratch_operands = 0 : i64, tpu.core_type = #tpu.core_type<tc>, window_params = [{transform_indices = @transform_0, window_bounds = array<i64: 8, 8>}, {pipeline_mode = #tpu.pipeline_mode<synchronous>, transform_indices = @transform_1, window_bounds = array<i64: 8, 128>}, {pipeline_mode = #tpu.pipeline_mode<synchronous>, transform_indices = @transform_2, window_bounds = array<i64: 1, 128>}, {transform_indices = @transform_3, window_bounds = array<i64: 8, 128>}]} {
    %c0 = arith.constant 0 : index
    %c0_0 = arith.constant 0 : index
    %0 = vector.load %arg1[%c0, %c0_0] : memref<8x8xf32, #tpu.memory_space<vmem>>, vector<8x8xf32>
    %c0_1 = arith.constant 0 : index
    %c0_2 = arith.constant 0 : index
    %1 = vector.load %arg2[%c0_1, %c0_2] : memref<8x128xf32, #tpu.memory_space<vmem>>, vector<8x128xf32>
    %cst = arith.constant dense<0.000000e+00> : vector<8x128xf32>
    %2 = tpu.matmul %0, %1, %cst {dimension_numbers = #tpu.dot_dimension_numbers<[1], [0], [0], [1], [0, 0, 1, 1], [], []>, precision = #tpu.contract_precision<fp32>} : vector<8x8xf32>, vector<8x128xf32>, vector<8x128xf32> -> vector<8x128xf32>
    %c0_3 = arith.constant 0 : index
    %c0_4 = arith.constant 0 : index
    %3 = vector.load %arg3[%c0_3, %c0_4] : memref<1x128xf32, #tpu.memory_space<vmem>>, vector<1x128xf32>
    %4 = vector.broadcast %3 : vector<1x128xf32> to vector<8x128xf32>
    %5 = arith.addf %2, %4 : vector<8x128xf32>
    %6 = math.sin %5 : vector<8x128xf32>
    %c0_5 = arith.constant 0 : index
    %c0_6 = arith.constant 0 : index
    %7 = vector.load %arg4[%c0_5, %c0_6] : memref<8x128xf32, #tpu.memory_space<vmem>>, vector<8x128xf32>
    tpu.vector_store %arg4[%c0_5, %c0_6], %6 {strides = array<i32>} : memref<8x128xf32, #tpu.memory_space<vmem>>, vector<8x128xf32>,
    return
  }
  func.func @transform_0(%arg0: i32) -> (i32, i32) {
    %c0_i32 = arith.constant 0 : i32
    %c0_i32_0 = arith.constant 0 : i32
    return %arg0, %c0_i32 : i32, i32
  }
  func.func @transform_1(%arg0: i32) -> (i32, i32) {
    %c0_i32 = arith.constant 0 : i32
    %c0_i32_0 = arith.constant 0 : i32
    %c0_i32_1 = arith.constant 0 : i32
    return %c0_i32, %c0_i32_0 : i32, i32
  }
  func.func @transform_2(%arg0: i32) -> (i32, i32) {
    %c0_i32 = arith.constant 0 : i32
    %c0_i32_0 = arith.constant 0 : i32
    %c0_i32_1 = arith.constant 0 : i32
    return %c0_i32, %c0_i32_0 : i32, i32
  }
  func.func @transform_3(%arg0: i32) -> (i32, i32) {
    %c0_i32 = arith.constant 0 : i32
    %c0_i32_0 = arith.constant 0 : i32
    return %arg0, %c0_i32 : i32, i32
  }
}

</mosaic_0001>

<bundles_post_ra>
// kernel: tpu_custom_call.1
= control target key start
LH: loop header
LB: loop body
LE: loop exit
PB: predicated region body
PF: predicated region fallthrough
CT: control target
= control target key end

     0   :  { %8 = vsyncpa [#allocation3], 0  ;;  %s878_s0 = inlined_call_operand.hbm [shape: f32[4,8], index: 0, kind: input, shape index: {}]   ;;  %s879_s1 = inlined_call_operand.hbm [shape: f32[8,128], index: 1, kind: input, shape index: {}]   ;;  %s880_s2 = inlined_call_operand.vmem [shape: f32[1,128], index: 2, kind: input, shape index: {}]   ;;  %s881_s3 = inlined_call_operand.hbm [shape: f32[4,128], index: 3, kind: output, shape index: {}]  }
   0x1   :  { %9 = vsyncpa [#allocation6], 0 }
   0x2   :  { %10 = vsyncpa [#allocation4], 0 }
   0x3   :  { %15 = vsyncadd [#allocation3], 64  ;;  %s773_s12 = smov [#allocation2]   ;;  %s701_s16 = scalar_lea.hbm %s878_s0, 64 }
   0x4   :  { %s16_s13 = sshll.u32 %s773_s12, 4  ;;  %p702_p0 = scmp.ne.s32.totalorder %s878_s0, %s701_s16  ;;  %s17_s13 = int_to_ptr.vmem [resolvable:$true] %s16_s13 }
   0x5   :  { %p705_p1 = scmp.lt.u32.totalorder %s701_s16, %s878_s0 }
   0x7   :  { %p707_p2 = pnand %p705_p1, %p702_p0 }
   0x9   :  { %710 = shalt.err (!%p707_p2)
}
   0xa   :  { %s711_s21 = scalar_lea.vmem %s17_s13, 64  ;;  %s715_s22 = scalar_lea.vmem %s17_s13, 128 }
   0xb   :  { %p712_p3 = scmp.ne.s32.totalorder %s17_s13, %s711_s21  ;;  %p716_p4 = scmp.lt.s32.totalorder %s17_s13, %s17_s13 }
   0xc   :  { %p717_p5 = scmp.lt.s32.totalorder %s715_s22, %s711_s21 }
   0xe   :  { %p718_p6 = por %p717_p5, %p716_p4 }
  0x10   :  { %p719_p7 = pnand %p718_p6, %p712_p3 }
  0x12   :  { %722 = shalt.err (!%p719_p7)
}
  0x13   :  { %s774_s23 = smov 64   ;;  %s775_s24 = smov 4  }
  0x14   :  { %22 = dma.hbm_to_vmem [thread:$0]  %s878_s0, 64, %s17_s13, [#allocation3], %s774_s23, %s774_s23, %s775_s24  }
  0x15   :  { %s776_s27 = smov [#allocation5]   ;;  %s723_s4 = scalar_lea.hbm %s879_s1, 128 }
  0x16   :  { %s29_s28 = sshll.u32 %s776_s27, 4  ;;  %p724_p8 = scmp.ne.s32.totalorder %s879_s1, %s723_s4  ;;  %s30_s28 = int_to_ptr.vmem [resolvable:$true] %s29_s28 }
  0x17   :  { %p727_p9 = scmp.lt.u32.totalorder %s723_s4, %s879_s1 }
  0x19   :  { %p729_p10 = pnand %p727_p9, %p724_p8 }
  0x1b   :  { %732 = shalt.err (!%p729_p10)
}
  0x1c   :  { %s733_s9 = scalar_lea.vmem %s30_s28, 128  ;;  %p738_p12 = scmp.lt.s32.totalorder %s30_s28, %s30_s28 }
  0x1d   :  { %p734_p11 = scmp.ne.s32.totalorder %s30_s28, %s733_s9  ;;  %p739_p13 = scmp.lt.s32.totalorder %s733_s9, %s733_s9 }
  0x1f   :  { %p740_p0 = por %p739_p13, %p738_p12 }
  0x21   :  { %p741_p1 = pnand %p740_p0, %p734_p11 }
  0x23   :  { %744 = shalt.err (!%p741_p1)
}
  0x24   :  { %32 = dma.hbm_to_vmem [thread:$0]  %s879_s1, 128, %s30_s28, [#allocation6]  }
  0x25   :  { %767 = dma.done.wait [#allocation3], 128  }
  0x26   :  { %768 = vsyncadd [#allocation3], 4294967168 }
  0x27   :  { %769 = dma.done.wait [#allocation6], 128  }
  0x28   :  { %770 = vsyncadd [#allocation6], 4294967168  ;;  %v777_v0 = vmov 0.0   ;;  %vm778_vm0 = vmmov 0   ;;  %vm50_vm1 = vcmask 64512   ;;  %v42_v1 = vld [vmem:[#allocation5] sm:$0xff] }
  0x29   :  { %655 = vmatprep.subr.mxu0 %v777_v0  ;;  %657 = vmatprep.mubr.msk.f32.mxu0 %vm778_vm0, %v777_v0  ;;  %v41_v2 = vld [vmem:[#allocation2] sm:$0xff]  ;;  %v55_v3 = vand.u32 4294901760, %v42_v1  ;;  %v779_v31 = vmov 683565275   ;;  %v780_v33 = vmov 2475754826  }
  0x2a   :  { %640 = vmatprep.subr.mxu1 %v777_v0  ;;  %642 = vmatprep.mubr.msk.f32.mxu1 %vm778_vm0, %v777_v0  ;;  %v52_v4 = vsel %vm50_vm1, %v41_v2, 0  ;;  %v623_v16 = vld [vmem:[%s880_s2] ss:$0 sm:$0xff]  ;;  %v781_v36 = vmov 2131351028  }
  0x2b   :  { %v120_v5 = vand.u32 4294901760, %v52_v4  ;;  %v132_v6 = vsub.f32 %v42_v1, %v55_v3  ;;  %656 = vmatpush3.msra.mxu0 %v55_v3  ;;  %641 = vmatpush3.msra.mxu1 %v55_v3  ;;  %v782_v39 = vmov 2102212464   ;;  %v783_v42 = vmov 920167782  }
  0x2c   :  { %645 = vmatprep.subr.mxu1 %v777_v0  ;;  %660 = vmatprep.subr.mxu0 %v777_v0  ;;  %v784_v45 = vmov 1326507024  }
  0x2d   :  { %v121_v7 = vsub.f32 %v52_v4, %v120_v5  ;;  %v133_v8 = vand.u32 4294901760, %v132_v6 }
  0x2f   :  { %v122_v9 = vand.u32 4294901760, %v121_v7  ;;  %v134_v10 = vsub.f32 %v132_v6, %v133_v8 }
  0x31   :  { %658 = vmatmul.mubr.f32.vlgmr.msra.gmra.mrb[0].mxu0 %v122_v9  ;;  %v123_v11 = vsub.f32 %v121_v7, %v122_v9  ;;  %v135_v12 = vand.u32 4294901760, %v134_v10 }
  0x32   :  { %661 = vmatpush3.msra.mxu0 %v133_v8  ;;  %662 = vmatprep.mubr.msk.f32.mxu0 %vm778_vm0, %v777_v0 }
  0x33   :  { %v124_v13 = vand.u32 4294901760, %v123_v11  ;;  %665 = vmatprep.subr.mxu0 %v777_v0 }
  0x35   :  { %643 = vmatmul.mubr.f32.vlgmr.msra.gmra.mrb[0].mxu1 %v124_v13 }
  0x36   :  { %646 = vmatpush3.msra.mxu1 %v135_v12  ;;  %647 = vmatprep.mubr.msk.f32.mxu1 %vm778_vm0, %v777_v0 }
  0x37   :  { %650 = vmatprep.subr.mxu1 %v777_v0 }
  0x39   :  { %663 = vmatmul.mubr.f32.vlgmr.msra.gmra.mrb[0].mxu0 %v120_v5 }
  0x3a   :  { %666 = vmatpush3.msra.mxu0 %v55_v3  ;;  %667 = vmatprep.mubr.msk.f32.mxu0 %vm778_vm0, %v777_v0 }
  0x3d   :  { %648 = vmatmul.mubr.f32.vlgmr.msra.gmra.mrb[0].mxu1 %v120_v5 }
  0x3e   :  { %651 = vmatpush3.msra.mxu1 %v132_v6  ;;  %652 = vmatprep.mubr.msk.f32.mxu1 %vm778_vm0, %v777_v0 }
  0x41   :  { %668 = vmatmul.mubr.f32.vlgmr.msra.gmra.mrb[0].mxu0 %v120_v5 }
  0x45   :  { %653 = vmatmul.mubr.f32.vlgmr.msra.gmra.mrb[0].mxu1 %v121_v7 }
 0x114   :  { %v496_v14 = vpop.f32.mrb[0].mxu0 }
 0x115   :  { %v669_v15 = vpop.f32.mrb[1].mxu0 }
 0x118   :  { %v276_v17 = vpop.f32.mrb[0].mxu1 }
 0x119   :  { %v670_v18 = vadd.f32 %v623_v16, %v276_v17  ;;  %v654_v19 = vpop.f32.mrb[1].mxu1 }
 0x11b   :  { %v842_v20 = vadd.f32 %v670_v18, %v496_v14 }
 0x11d   :  { %v503_v21 = vand.u32 2139095040, %v842_v20  ;;  %v500_v25 = vand.u32 2147483647, %v842_v20  ;;  %vm502_vm9 = vcmp.lt.s32.totalorder %v842_v20, 0  ;;  %vm592_vm14 = vweird.f32 %v842_v20 }
 0x11f   :  { %v504_v22 = vshrl.u32 %v503_v21, 23  ;;  %v507_v28 = vand.u32 8388607, %v500_v25  ;;  %vm501_vm10 = vcmp.le.f32.partialorder %v500_v25, 0.7853982 }
 0x121   :  { %v624_v23 = vadd.s32 4294967169, %v504_v22  ;;  %v508_v47 = vor.u32 8388608, %v507_v28 }
 0x123   :  { %v510_v24 = vadd.s32 1, %v624_v23  ;;  %v548_v61 = vshll.u32 %v508_v47, 8 }
 0x125   :  { %vm511_vm2 = vcmp.gt.s32.totalorder %v510_v24, 0 }
 0x126   :  { %v512_v26 = vsel %vm511_vm2, %v510_v24, 0 }
 0x127   :  { %v514_v27 = vand.u32 31, %v512_v26  ;;  %v513_v30 = vshrl.u32 %v512_v26, 5 }
 0x129   :  { %v515_v29 = vsub.s32 32, %v514_v27  ;;  %v517_v32 = vshll.u32 %v779_v31, %v514_v27  ;;  %v520_v34 = vshll.u32 %v780_v33, %v514_v27  ;;  %v523_v38 = vshll.u32 %v781_v36, %v514_v27 }
 0x12a   :  { %v526_v41 = vshll.u32 %v782_v39, %v514_v27  ;;  %v529_v44 = vshll.u32 %v783_v42, %v514_v27  ;;  %vm532_vm3 = vcmp.lt.s32.totalorder %v513_v30, 1  ;;  %vm535_vm4 = vcmp.lt.s32.totalorder %v513_v30, 4 }
 0x12b   :  { %v518_v35 = vshrl.u32 %v780_v33, %v515_v29  ;;  %v521_v37 = vshrl.u32 %v781_v36, %v515_v29  ;;  %v524_v40 = vshrl.u32 %v782_v39, %v515_v29  ;;  %v527_v43 = vshrl.u32 %v783_v42, %v515_v29 }
 0x12c   :  { %v530_v46 = vshrl.u32 %v784_v45, %v515_v29  ;;  %v516_v56 = vshrl.u32 %v779_v31, %v515_v29  ;;  %vm534_vm5 = vcmp.lt.s32.totalorder %v513_v30, 3  ;;  %vm533_vm6 = vcmp.lt.s32.totalorder %v513_v30, 2 }
 0x12d   :  { %v519_v48 = vor.u32 %v518_v35, %v517_v32  ;;  %v522_v49 = vor.u32 %v521_v37, %v520_v34  ;;  %v525_v50 = vor.u32 %v524_v40, %v523_v38  ;;  %v528_v51 = vor.u32 %v527_v43, %v526_v41 }
 0x12e   :  { %v531_v52 = vor.u32 %v530_v46, %v529_v44 }
 0x12f   :  { %v537_v53 = vsel %vm535_vm4, %v525_v50, 2102212464  ;;  %v540_v54 = vsel %vm532_vm3, %v519_v48, %v522_v49  ;;  %v544_v55 = vsel %vm532_vm3, %v522_v49, %v525_v50  ;;  %v541_v57 = vsel %vm535_vm4, %v528_v51, 920167782 }
 0x130   :  { %v545_v58 = vsel %vm535_vm4, %v531_v52, 1326507024  ;;  %v542_v59 = vsel %vm534_vm5, %v525_v50, %v541_v57  ;;  %v536_v62 = vsel %vm532_vm3, %v516_v56, %v519_v48  ;;  %v538_v63 = vsel %vm534_vm5, %v522_v49, %v537_v53 }
 0x131   :  { %v546_v60 = vsel %vm534_vm5, %v528_v51, %v545_v58  ;;  %v543_v0 = vsel %vm533_vm6, %v540_v54, %v542_v59  ;;  %v539_v6 = vsel %vm533_vm6, %v536_v62, %v538_v63 }
 0x132   :  { %v547_v1 = vsel %vm533_vm6, %v544_v55, %v546_v60  ;;  %v851_v4 = vmul.u32.u64.low %v548_v61, %v543_v0  ;;  %v852_v5 = vmul.u32.u64.high %v548_v61, %v543_v0, %v851_v4  ;;  %v555_v8 = vmul.u32 %v548_v61, %v539_v6 }
 0x133   :  { %v848_v2 = vmul.u32.u64.low %v548_v61, %v547_v1  ;;  %v849_v3 = vmul.u32.u64.high %v548_v61, %v547_v1, %v848_v2 }
 0x134   :  { %v558_v7 = vadd.s32 1, %v852_v5 }
 0x135   :  { %vm557_vm7 = vc.u32 %v849_v3, %v851_v4  ;;  %v556_v21 = vadd.s32 %v851_v4, %v849_v3 }
 0x136   :  { %v559_v9 = vsel %vm557_vm7, %v558_v7, %v852_v5 }
 0x137   :  { %v560_v10 = vadd.s32 %v559_v9, %v555_v8 }
 0x139   :  { %v561_v11 = vadd.s32 536870912, %v560_v10 }
 0x13b   :  { %v562_v12 = vshrl.u32 %v561_v11, 30 }
 0x13d   :  { %v563_v13 = vshll.u32 %v562_v12, 30  ;;  %v586_v34 = vsub.s32 4, %v562_v12 }
 0x13f   :  { %v564_v14 = vsub.s32 %v560_v10, %v563_v13  ;;  %v587_v37 = vsel %vm502_vm9, %v586_v34, %v562_v12 }
 0x140   :  { %v589_v39 = vsel %vm501_vm10, 0, %v587_v37 }
 0x141   :  { %v566_v15 = vsub.s32 0, %v564_v14  ;;  %v593_v40 = vadd.s32 3, %v589_v39 }
 0x143   :  { %v625_v16 = vmin.u32 %v566_v15, %v564_v14  ;;  %v594_v41 = vand.u32 3, %v593_v40 }
 0x145   :  { %v568_v17 = vclz %v625_v16  ;;  %vm599_vm11 = vcmp.eq.s32.totalorder %v594_v41, 2  ;;  %vm596_vm12 = vcmp.eq.s32.totalorder %v594_v41, 0  ;;  %vm595_vm13 = vcmp.lt.s32.totalorder %v594_v41, 2 }
 0x147   :  { %v626_v18 = vadd.s32 4294967294, %v568_v17 }
 0x149   :  { %vm627_vm8 = vcmp.lt.s32.totalorder %v626_v18, 0 }
 0x14a   :  { %v571_v19 = vsel %vm627_vm8, 0, %v626_v18 }
 0x14b   :  { %v572_v22 = vsub.s32 32, %v571_v19  ;;  %v576_v23 = vsub.s32 4294967266, %v571_v19  ;;  %v573_v24 = vshll.u32 %v564_v14, %v571_v19 }
 0x14d   :  { %v574_v26 = vshrl.u32 %v556_v21, %v572_v22  ;;  %v577_v27 = vadd.s32 127, %v576_v23 }
 0x14f   :  { %v575_v28 = vor.u32 %v574_v26, %v573_v24  ;;  %v578_v29 = vshll.u32 %v577_v27, 23 }
 0x151   :  { %v579_v30 = vor.u32 4788187, %v578_v29  ;;  %v582_v32 = vcvt.s32.f32 %v575_v28 }
 0x153   :  { %v580_v31 = vand.u32 2147483647, %v579_v30 }
 0x155   :  { %v583_v33 = vmul.f32 %v582_v32, %v580_v31 }
 0x157   :  { %v584_v35 = vxor.u32 2147483648, %v583_v33 }
 0x159   :  { %v585_v36 = vsel %vm502_vm9, %v584_v35, %v583_v33 }
 0x15a   :  { %v588_v38 = vsel %vm501_vm10, %v842_v20, %v585_v36 }
 0x15b   :  { %697 = vcosq.f32 %v588_v38 }
 0x15c   :  { %699 = vsinq.f32 %v588_v38 }
 0x165   :  { %v698_v42 = vpop.eup %697 }
 0x166   :  { %v700_v43 = vpop.eup %699  ;;  %v600_v44 = vxor.u32 2147483648, %v698_v42 }
 0x167   :  { %v597_v45 = vxor.u32 2147483648, %v700_v43 }
 0x168   :  { %v601_v46 = vsel %vm599_vm11, %v600_v44, %v700_v43 }
 0x169   :  { %v598_v47 = vsel %vm596_vm12, %v698_v42, %v597_v45 }
 0x16a   :  { %v602_v25 = vsel %vm595_vm13, %v598_v47, %v601_v46 }
 0x16b   :  { %v603_v48 = vsel %vm592_vm14, nan, %v602_v25 }
 0x16c   :  { %604 = vst [vmem:[#allocation7] sm:$0xff] %v603_v48 }
 0x16d   :  { %609 = vsyncadd [#allocation4], 64  ;;  %s785_s2 = smov [#allocation7]  }
 0x16e   :  { %s610_s12 = sshll.u32 %s785_s2, 4  ;;  %s611_s12 = int_to_ptr.vmem [resolvable:$true] %s610_s12 }
 0x16f   :  { %s745_s13 = scalar_lea.vmem %s611_s12, 64  ;;  %s749_s14 = scalar_lea.vmem %s611_s12, 128 }
 0x170   :  { %p746_p2 = scmp.ne.s32.totalorder %s611_s12, %s745_s13  ;;  %p750_p3 = scmp.lt.s32.totalorder %s611_s12, %s611_s12 }
 0x171   :  { %p751_p4 = scmp.lt.s32.totalorder %s749_s14, %s745_s13 }
 0x173   :  { %p752_p5 = por %p751_p4, %p750_p3 }
 0x175   :  { %p753_p6 = pnand %p752_p5, %p746_p2 }
 0x177   :  { %756 = shalt.err (!%p753_p6)
}
 0x178   :  { %s757_s17 = scalar_lea.hbm %s881_s3, 64 }
 0x179   :  { %p758_p7 = scmp.ne.s32.totalorder %s881_s3, %s757_s17  ;;  %p761_p8 = scmp.lt.u32.totalorder %s757_s17, %s881_s3 }
 0x17b   :  { %p763_p9 = pnand %p761_p8, %p758_p7 }
 0x17d   :  { %766 = shalt.err (!%p763_p9)
}
 0x17e   :  { %616 = dma.vmem_to_hbm [thread:$0]  %s611_s12, 64, %s881_s3, [#allocation4], %s774_s23, %s774_s23, %s775_s24  }
 0x17f   :  { %771 = dma.done.wait [#allocation4], 128  }
 0x180   :  { %772 = vsyncadd [#allocation4], 4294967168 }
 0x181   :  { %620 = vsyncpa [#allocation3], 1 }
 0x182   :  { %621 = vsyncpa [#allocation6], 1 }
 0x183   :  { %622 = vsyncpa [#allocation4], 1 }

</bundles_post_ra>
